<compile_context>
chip_gen: v6e
topology: v6e:2x2x1
jax: 0.10.0
libtpu: 0.0.40
codegen_flags: <defaults>
</compile_context>

<pallas_src>
import jax
import jax.numpy as jnp
from jax import lax
from jax.experimental import pallas as pl
from jax.experimental.pallas import tpu as pltpu

CONF_THRES = 0.01   # CustomWrapper.conf
IOU_THRES = 0.45    # CustomWrapper.iou (unused: the supplied non_max_suppression has no IoU step)
# TODO(synk): PIL/requests/letterbox/EXIF image loading, scale_coords and the Detections
# wrapper are host-side glue with no Pallas equivalent; the wrapped backbone is represented
# by a synthetic 1x1-conv detection head (the real model is not part of the spec).


def _pick_tile_r(R: int, B: int, cap: int = 512) -> int:
    """Rows (of 128 pixels) per grid tile.

    Largest divisor of R that is a multiple of 8 and <= cap (prefer multiples of 32 for
    clean uint8 packing), while keeping at least 2 total grid steps so the two 'parallel'
    axes can shard across v7x's two TensorCores.
    """
    if R <= 8:
        return R
    div8 = [d for d in range(8, min(R, cap) + 1, 8) if R % d == 0]
    if not div8:
        # Ragged fallback: whole image per block (block dim == full dim is always legal).
        return R

    def pick(cands):
        best = max(cands)
        m32 = [d for d in cands if d % 32 == 0]
        if m32 and max(m32) * 4 >= best:
            return max(m32)
        return best

    t = pick(div8)
    if B * (R // t) < 2:                      # keep >= 2 grid steps for megacore sharding
        smaller = [d for d in div8 if R // d >= 2]
        if smaller:
            t = pick(smaller)
    return t


def _pick_chunk_r(tile_r: int, itemsize: int) -> int:
    """In-kernel strip-mine size.  32 rows = 4 f32 vregs = one packed uint8 tile."""
    if tile_r % 32 == 0:
        return 32
    if itemsize == 4 and tile_r % 8 == 0:     # f32 input: 8-row (one-vreg) chunks are aligned
        return 8
    return tile_r                             # tiny / ragged tile: single chunk


def _make_detect_kernel(scale_x: float, scale_y: float, C: int, D: int,
                        tile_r: int, chunk_r: int):
    nc = D - 5
    n_chunks = tile_r // chunk_r
    half_x = 0.5 * scale_x
    half_y = 0.5 * scale_y

    def kernel(w_ref, b_ref, x_ref, det_ref, cnt_ref):
        # w_ref: SMEM (C, D)   weights already scaled by 1/255
        # b_ref: SMEM (D,)
        # x_ref: VMEM (1, C, TILE_R, 128)   raw pixel values in [0, 255] (uint8 or f32)
        # det_ref: VMEM (1, 6, TILE_R, 128) rows = [x1, y1, x2, y2, conf, cls]
        # cnt_ref: VMEM (1, 1, 1, 128)      per-tile keep-count lane partial sums

        # hoist the tiny SMEM scalar reads out of the chunk loop
        wv = [[w_ref[c, d] for d in range(D)] for c in range(C)]
        bv = [b_ref[d] for d in range(D)]

        cnt_ref[0, 0] = jnp.zeros((1, 128), jnp.float32)

        def chunk(ci):
            r0 = ci * chunk_r
            if not isinstance(r0, int):
                r0 = pl.multiple_of(r0, chunk_r)
            rows = pl.ds(r0, chunk_r)

            # load + cast one chunk per channel (uint8 -> f32 cast is free VPU filler)
            xs = [x_ref[0, c, rows, :].astype(jnp.float32) for c in range(C)]

            def head(d):
                # 1x1-conv / linear head channel d as C unrolled scalar-broadcast FMAs (VPU)
                acc = xs[0] * wv[0][d] + bv[d]
                for c in range(1, C):
                    acc = acc + xs[c] * wv[c][d]
                return acc

            # YOLO-style sigmoid only on the 5 box/objectness channels; class channels stay
            # raw logits (sigmoid is monotone and only the argmax index is used downstream).
            cx = jax.nn.sigmoid(head(0)) * scale_x
            cy = jax.nn.sigmoid(head(1)) * scale_y
            hw = jax.nn.sigmoid(head(2)) * half_x      # half-width, size folded into one mul
            hh = jax.nn.sigmoid(head(3)) * half_y
            obj = jax.nn.sigmoid(head(4))

            # non_max_suppression semantics exactly as supplied (multi_label=False,
            # classes=None, no IoU step): both confidence filters use prediction[..., 4]
            # (objectness) and the output 'conf' column is x[:, 4:5] (objectness).
            keepf = (obj > CONF_THRES).astype(jnp.float32)

            # j = argmax_k of x[:, 5:] * x[:, 4:5]; obj > 0 is a positive per-pixel scale and
            # sigmoid is monotone, so argmax over raw class logits is identical.
            best = head(5)
            best_idx = jnp.zeros_like(best)
            for k in range(1, nc):
                lk = head(5 + k)
                better = lk > best
                best_idx = jnp.where(better, jnp.float32(k), best_idx)
                best = jnp.maximum(best, lk)

            cxk = cx * keepf
            cyk = cy * keepf
            hwk = hw * keepf
            hhk = hh * keepf
            det_ref[0, 0, rows, :] = cxk - hwk
            det_ref[0, 1, rows, :] = cyk - hhk
            det_ref[0, 2, rows, :] = cxk + hwk
            det_ref[0, 3, rows, :] = cyk + hhk
            det_ref[0, 4, rows, :] = obj * keepf
            det_ref[0, 5, rows, :] = best_idx * keepf

            cnt_ref[0, 0] += jnp.sum(keepf, axis=0, keepdims=True)

        if n_chunks == 1:
            chunk(0)                           # static full-extent slices
        else:
            def loop_body(ci, carry):
                chunk(ci)
                return carry
            lax.fori_loop(0, n_chunks, loop_body, 0)

    return kernel


def custom_wrapper_forward(imgs_nchw, w, b):
    """imgs_nchw: (B, C, H, W) uint8 or float32, raw pixel values in [0, 255];
       w: (C, 5+nc) float detection-head weights; b: (5+nc,) bias.

    Returns:
      det:    (B, 6, H*W) float32, channel-major rows [x1, y1, x2, y2, conf, cls].
              Rows with conf == 0 are dropped detections (gate on conf > 0).
      counts: (B,) int32 number of surviving detections per image.
    """
    B, C, H, W = imgs_nchw.shape
    N = H * W
    if N % 128 != 0:
        raise ValueError("H*W must be a multiple of 128 (letterboxed YOLO inputs are)")
    R = N // 128
    D = w.shape[1]
    itemsize = jnp.dtype(imgs_nchw.dtype).itemsize

    TILE_R = _pick_tile_r(R, B)
    NT = R // TILE_R
    CHUNK_R = _pick_chunk_r(TILE_R, itemsize)

    # Free, transpose-less view: channel-major with pixels on (sublane, lane).
    x4 = imgs_nchw.reshape(B, C, R, 128)
    w_s = (w.astype(jnp.float32) * (1.0 / 255.0))   # fold /255 preprocess into tiny weight
    b_s = b.astype(jnp.float32)

    kernel = _make_detect_kernel(float(W), float(H), C, D, TILE_R, CHUNK_R)

    # Advisory cost estimate for XLA's scheduler.
    in_bytes = B * N * C * itemsize
    out_bytes = B * N * 6 * 4 + B * NT * 128 * 4
    cost = pl.CostEstimate(flops=int(B * N * (6 * D + 25)),
                           transcendentals=int(5 * B * N),
                           bytes_accessed=int(in_bytes + out_bytes))

    # Double-buffered per-block footprint; only raise the scoped-VMEM limit if the (rare)
    # ragged whole-image fallback produces a big block (default is 16 MiB on v5e).
    blk_bytes = 2 * (C * TILE_R * 128 * itemsize + 6 * TILE_R * 128 * 4 + 512)
    vmem_limit = None
    if blk_bytes > 12 * (1 << 20):
        vmem_limit = min(int(blk_bytes * 3 // 2) + (4 << 20), 48 << 20)

    det4, cnt4 = pl.pallas_call(
        kernel,
        out_shape=(
            jax.ShapeDtypeStruct((B, 6, R, 128), jnp.float32),
            jax.ShapeDtypeStruct((B, NT, 1, 128), jnp.float32),
        ),
        grid_spec=pltpu.PrefetchScalarGridSpec(
            num_scalar_prefetch=0,
            grid=(B, NT),
            in_specs=[
                pl.BlockSpec(memory_space=pltpu.MemorySpace.SMEM),          # w (C, D)
                pl.BlockSpec(memory_space=pltpu.MemorySpace.SMEM),          # b (D,)
                pl.BlockSpec((1, C, TILE_R, 128), lambda bb, t: (bb, 0, t, 0)),
            ],
            out_specs=[
                pl.BlockSpec((1, 6, TILE_R, 128), lambda bb, t: (bb, 0, t, 0)),
                pl.BlockSpec((1, 1, 1, 128), lambda bb, t: (bb, t, 0, 0)),
            ],
        ),
        compiler_params=pltpu.CompilerParams(
            dimension_semantics=("parallel", "parallel"),
            vmem_limit_bytes=vmem_limit),
        cost_estimate=cost,
    )(w_s, b_s, x4)

    det = det4.reshape(B, 6, N)                              # free view
    counts = jnp.sum(cnt4[:, :, 0, :], axis=(1, 2)).astype(jnp.int32)
    return det, counts


def _reference(imgs, w, b, conf_thres=CONF_THRES):
    """Pure-JAX reference for the same (synthetic-head) forward."""
    B, C, H, W = imgs.shape
    N = H * W
    x = (imgs.astype(jnp.float32) / 255.0).reshape(B, C, N).transpose(0, 2, 1)   # (B, N, C)
    y = x @ w.astype(jnp.float32) + b.astype(jnp.float32)                        # (B, N, D)
    sig = jax.nn.sigmoid(y)
    cx = sig[..., 0] * W
    cy = sig[..., 1] * H
    bw = sig[..., 2] * W
    bh = sig[..., 3] * H
    obj = sig[..., 4]
    keep = (obj > conf_thres).astype(jnp.float32)
    cls_idx = jnp.argmax(y[..., 5:], axis=-1).astype(jnp.float32)
    det = jnp.stack([(cx - 0.5 * bw) * keep, (cy - 0.5 * bh) * keep,
                     (cx + 0.5 * bw) * keep, (cy + 0.5 * bh) * keep,
                     obj * keep, cls_idx * keep], axis=1)                        # (B, 6, N)
    counts = jnp.sum(keep, axis=-1).astype(jnp.int32)
    return det, counts


if __name__ == "__main__":
    import numpy as np

    key = jax.random.PRNGKey(0)
    kw, kb, ki1, ki2 = jax.random.split(key, 4)

    C, NC = 3, 3                         # 3 input channels, synthetic 3-class head
    D = 5 + NC                           # [cx, cy, w, h, obj, cls...]
    w = jax.random.normal(kw, (C, D), dtype=jnp.float32) * 0.5
    b = jax.random.normal(kb, (D,), dtype=jnp.float32) * 0.1

    # Config A: tiny f32 images (full-dim block, single-chunk path).
    B1, H1, W1 = 2, 16, 16
    imgs_f32 = jax.random.uniform(ki1, (B1, C, H1, W1), dtype=jnp.float32) * 255.0
    # Config B: uint8 images large enough to exercise multi-chunk strip-mining (TILE_R=128).
    B2, H2, W2 = 2, 128, 128
    imgs_u8 = jax.random.randint(ki2, (B2, C, H2, W2), 0, 256,
                                 dtype=jnp.int32).astype(jnp.uint8)

    for imgs, (Bx, Hx, Wx) in ((imgs_f32, (B1, H1, W1)), (imgs_u8, (B2, H2, W2))):
        det, counts = custom_wrapper_forward(imgs, w, b)
        jax.block_until_ready((det, counts))
        assert det.shape == (Bx, 6, Hx * Wx)
        assert counts.shape == (Bx,)
        ref_det, _ = _reference(imgs, w, b)
        # box + conf rows must match the reference; class row checked only for shape
        # (argmax near-ties can legitimately differ by float rounding order).
        np.testing.assert_allclose(np.asarray(det[:, :5]), np.asarray(ref_det[:, :5]),
                                   atol=1e-2, rtol=0)

    print("KERNEL_OK")
</pallas_src>

<mosaic_0001>
module attributes {stable_mosaic.version = 11 : i64} {
  func.func @kernel(%arg0: i32, %arg1: i32, %arg2: memref<3x8xf32, #tpu.memory_space<smem>>, %arg3: memref<8xf32, #tpu.memory_space<smem>>, %arg4: memref<1x3x2x128xf32, #tpu.memory_space<vmem>>, %arg5: memref<1x6x2x128xf32, #tpu.memory_space<vmem>>, %arg6: memref<1x1x1x128xf32, #tpu.memory_space<vmem>>) attributes {dimension_semantics = [#tpu.dimension_semantics<parallel>, #tpu.dimension_semantics<parallel>], iteration_bounds = array<i64: 2, 1>, scalar_prefetch = 0 : i64, scratch_operands = 0 : i64, tpu.core_type = #tpu.core_type<tc>, window_params = [{transform_indices = @transform_0, window_bounds = array<i64: 3, 8>}, {transform_indices = @transform_1, window_bounds = array<i64: 8>}, {transform_indices = @transform_2, window_bounds = array<i64: 1, 3, 2, 128>}, {transform_indices = @transform_3, window_bounds = array<i64: 1, 6, 2, 128>}, {transform_indices = @transform_4, window_bounds = array<i64: 1, 1, 1, 128>}]} {
    %c0 = arith.constant 0 : index
    %c0_0 = arith.constant 0 : index
    %0 = memref.load %arg2[%c0, %c0_0] : memref<3x8xf32, #tpu.memory_space<smem>>
    %c0_1 = arith.constant 0 : index
    %c1 = arith.constant 1 : index
    %1 = memref.load %arg2[%c0_1, %c1] : memref<3x8xf32, #tpu.memory_space<smem>>
    %c0_2 = arith.constant 0 : index
    %c2 = arith.constant 2 : index
    %2 = memref.load %arg2[%c0_2, %c2] : memref<3x8xf32, #tpu.memory_space<smem>>
    %c0_3 = arith.constant 0 : index
    %c3 = arith.constant 3 : index
    %3 = memref.load %arg2[%c0_3, %c3] : memref<3x8xf32, #tpu.memory_space<smem>>
    %c0_4 = arith.constant 0 : index
    %c4 = arith.constant 4 : index
    %4 = memref.load %arg2[%c0_4, %c4] : memref<3x8xf32, #tpu.memory_space<smem>>
    %c0_5 = arith.constant 0 : index
    %c5 = arith.constant 5 : index
    %5 = memref.load %arg2[%c0_5, %c5] : memref<3x8xf32, #tpu.memory_space<smem>>
    %c0_6 = arith.constant 0 : index
    %c6 = arith.constant 6 : index
    %6 = memref.load %arg2[%c0_6, %c6] : memref<3x8xf32, #tpu.memory_space<smem>>
    %c0_7 = arith.constant 0 : index
    %c7 = arith.constant 7 : index
    %7 = memref.load %arg2[%c0_7, %c7] : memref<3x8xf32, #tpu.memory_space<smem>>
    %c1_8 = arith.constant 1 : index
    %c0_9 = arith.constant 0 : index
    %8 = memref.load %arg2[%c1_8, %c0_9] : memref<3x8xf32, #tpu.memory_space<smem>>
    %c1_10 = arith.constant 1 : index
    %c1_11 = arith.constant 1 : index
    %9 = memref.load %arg2[%c1_10, %c1_11] : memref<3x8xf32, #tpu.memory_space<smem>>
    %c1_12 = arith.constant 1 : index
    %c2_13 = arith.constant 2 : index
    %10 = memref.load %arg2[%c1_12, %c2_13] : memref<3x8xf32, #tpu.memory_space<smem>>
    %c1_14 = arith.constant 1 : index
    %c3_15 = arith.constant 3 : index
    %11 = memref.load %arg2[%c1_14, %c3_15] : memref<3x8xf32, #tpu.memory_space<smem>>
    %c1_16 = arith.constant 1 : index
    %c4_17 = arith.constant 4 : index
    %12 = memref.load %arg2[%c1_16, %c4_17] : memref<3x8xf32, #tpu.memory_space<smem>>
    %c1_18 = arith.constant 1 : index
    %c5_19 = arith.constant 5 : index
    %13 = memref.load %arg2[%c1_18, %c5_19] : memref<3x8xf32, #tpu.memory_space<smem>>
    %c1_20 = arith.constant 1 : index
    %c6_21 = arith.constant 6 : index
    %14 = memref.load %arg2[%c1_20, %c6_21] : memref<3x8xf32, #tpu.memory_space<smem>>
    %c1_22 = arith.constant 1 : index
    %c7_23 = arith.constant 7 : index
    %15 = memref.load %arg2[%c1_22, %c7_23] : memref<3x8xf32, #tpu.memory_space<smem>>
    %c2_24 = arith.constant 2 : index
    %c0_25 = arith.constant 0 : index
    %16 = memref.load %arg2[%c2_24, %c0_25] : memref<3x8xf32, #tpu.memory_space<smem>>
    %c2_26 = arith.constant 2 : index
    %c1_27 = arith.constant 1 : index
    %17 = memref.load %arg2[%c2_26, %c1_27] : memref<3x8xf32, #tpu.memory_space<smem>>
    %c2_28 = arith.constant 2 : index
    %c2_29 = arith.constant 2 : index
    %18 = memref.load %arg2[%c2_28, %c2_29] : memref<3x8xf32, #tpu.memory_space<smem>>
    %c2_30 = arith.constant 2 : index
    %c3_31 = arith.constant 3 : index
    %19 = memref.load %arg2[%c2_30, %c3_31] : memref<3x8xf32, #tpu.memory_space<smem>>
    %c2_32 = arith.constant 2 : index
    %c4_33 = arith.constant 4 : index
    %20 = memref.load %arg2[%c2_32, %c4_33] : memref<3x8xf32, #tpu.memory_space<smem>>
    %c2_34 = arith.constant 2 : index
    %c5_35 = arith.constant 5 : index
    %21 = memref.load %arg2[%c2_34, %c5_35] : memref<3x8xf32, #tpu.memory_space<smem>>
    %c2_36 = arith.constant 2 : index
    %c6_37 = arith.constant 6 : index
    %22 = memref.load %arg2[%c2_36, %c6_37] : memref<3x8xf32, #tpu.memory_space<smem>>
    %c2_38 = arith.constant 2 : index
    %c7_39 = arith.constant 7 : index
    %23 = memref.load %arg2[%c2_38, %c7_39] : memref<3x8xf32, #tpu.memory_space<smem>>
    %c0_40 = arith.constant 0 : index
    %24 = memref.load %arg3[%c0_40] : memref<8xf32, #tpu.memory_space<smem>>
    %c1_41 = arith.constant 1 : index
    %25 = memref.load %arg3[%c1_41] : memref<8xf32, #tpu.memory_space<smem>>
    %c2_42 = arith.constant 2 : index
    %26 = memref.load %arg3[%c2_42] : memref<8xf32, #tpu.memory_space<smem>>
    %c3_43 = arith.constant 3 : index
    %27 = memref.load %arg3[%c3_43] : memref<8xf32, #tpu.memory_space<smem>>
    %c4_44 = arith.constant 4 : index
    %28 = memref.load %arg3[%c4_44] : memref<8xf32, #tpu.memory_space<smem>>
    %c5_45 = arith.constant 5 : index
    %29 = memref.load %arg3[%c5_45] : memref<8xf32, #tpu.memory_space<smem>>
    %c6_46 = arith.constant 6 : index
    %30 = memref.load %arg3[%c6_46] : memref<8xf32, #tpu.memory_space<smem>>
    %c7_47 = arith.constant 7 : index
    %31 = memref.load %arg3[%c7_47] : memref<8xf32, #tpu.memory_space<smem>>
    %cst = arith.constant 0.000000e+00 : f32
    %32 = vector.broadcast %cst : f32 to vector<1x128xf32>
    %c0_48 = arith.constant 0 : index
    %c0_49 = arith.constant 0 : index
    %c0_50 = arith.constant 0 : index
    %c0_51 = arith.constant 0 : index
    %33 = vector.load %arg6[%c0_48, %c0_49, %c0_50, %c0_51] : memref<1x1x1x128xf32, #tpu.memory_space<vmem>>, vector<1x1x1x128xf32>
    %34 = vector.shape_cast %33 : vector<1x1x1x128xf32> to vector<1x128xf32>
    %35 = vector.shape_cast %32 : vector<1x128xf32> to vector<1x1x1x128xf32>
    tpu.vector_store %arg6[%c0_48, %c0_49, %c0_50, %c0_51], %35 {strides = array<i32>} : memref<1x1x1x128xf32, #tpu.memory_space<vmem>>, vector<1x1x1x128xf32>,
    %c0_52 = arith.constant 0 : index
    %c0_53 = arith.constant 0 : index
    %c0_54 = arith.constant 0 : index
    %c0_55 = arith.constant 0 : index
    %36 = vector.load %arg4[%c0_52, %c0_53, %c0_54, %c0_55] : memref<1x3x2x128xf32, #tpu.memory_space<vmem>>, vector<1x1x2x128xf32>
    %37 = vector.shape_cast %36 : vector<1x1x2x128xf32> to vector<2x128xf32>
    %c0_56 = arith.constant 0 : index
    %c1_57 = arith.constant 1 : index
    %c0_58 = arith.constant 0 : index
    %c0_59 = arith.constant 0 : index
    %38 = vector.load %arg4[%c0_56, %c1_57, %c0_58, %c0_59] : memref<1x3x2x128xf32, #tpu.memory_space<vmem>>, vector<1x1x2x128xf32>
    %39 = vector.shape_cast %38 : vector<1x1x2x128xf32> to vector<2x128xf32>
    %c0_60 = arith.constant 0 : index
    %c2_61 = arith.constant 2 : index
    %c0_62 = arith.constant 0 : index
    %c0_63 = arith.constant 0 : index
    %40 = vector.load %arg4[%c0_60, %c2_61, %c0_62, %c0_63] : memref<1x3x2x128xf32, #tpu.memory_space<vmem>>, vector<1x1x2x128xf32>
    %41 = vector.shape_cast %40 : vector<1x1x2x128xf32> to vector<2x128xf32>
    %42 = vector.broadcast %0 : f32 to vector<2x128xf32>
    %43 = arith.mulf %37, %42 : vector<2x128xf32>
    %44 = vector.broadcast %24 : f32 to vector<2x128xf32>
    %45 = arith.addf %43, %44 : vector<2x128xf32>
    %46 = vector.broadcast %8 : f32 to vector<2x128xf32>
    %47 = arith.mulf %39, %46 : vector<2x128xf32>
    %48 = arith.addf %45, %47 : vector<2x128xf32>
    %49 = vector.broadcast %16 : f32 to vector<2x128xf32>
    %50 = arith.mulf %41, %49 : vector<2x128xf32>
    %51 = arith.addf %48, %50 : vector<2x128xf32>
    %52 = arith.negf %51 : vector<2x128xf32>
    %53 = math.exp %52 : vector<2x128xf32>
    %cst_64 = arith.constant 1.000000e+00 : f32
    %54 = vector.broadcast %cst_64 : f32 to vector<2x128xf32>
    %55 = arith.addf %54, %53 : vector<2x128xf32>
    %56 = arith.divf %54, %55 : vector<2x128xf32>
    %cst_65 = arith.constant 1.600000e+01 : f32
    %57 = vector.broadcast %cst_65 : f32 to vector<2x128xf32>
    %58 = arith.mulf %56, %57 : vector<2x128xf32>
    %59 = vector.broadcast %1 : f32 to vector<2x128xf32>
    %60 = arith.mulf %37, %59 : vector<2x128xf32>
    %61 = vector.broadcast %25 : f32 to vector<2x128xf32>
    %62 = arith.addf %60, %61 : vector<2x128xf32>
    %63 = vector.broadcast %9 : f32 to vector<2x128xf32>
    %64 = arith.mulf %39, %63 : vector<2x128xf32>
    %65 = arith.addf %62, %64 : vector<2x128xf32>
    %66 = vector.broadcast %17 : f32 to vector<2x128xf32>
    %67 = arith.mulf %41, %66 : vector<2x128xf32>
    %68 = arith.addf %65, %67 : vector<2x128xf32>
    %69 = arith.negf %68 : vector<2x128xf32>
    %70 = math.exp %69 : vector<2x128xf32>
    %cst_66 = arith.constant 1.000000e+00 : f32
    %71 = vector.broadcast %cst_66 : f32 to vector<2x128xf32>
    %72 = arith.addf %71, %70 : vector<2x128xf32>
    %73 = arith.divf %71, %72 : vector<2x128xf32>
    %cst_67 = arith.constant 1.600000e+01 : f32
    %74 = vector.broadcast %cst_67 : f32 to vector<2x128xf32>
    %75 = arith.mulf %73, %74 : vector<2x128xf32>
    %76 = vector.broadcast %2 : f32 to vector<2x128xf32>
    %77 = arith.mulf %37, %76 : vector<2x128xf32>
    %78 = vector.broadcast %26 : f32 to vector<2x128xf32>
    %79 = arith.addf %77, %78 : vector<2x128xf32>
    %80 = vector.broadcast %10 : f32 to vector<2x128xf32>
    %81 = arith.mulf %39, %80 : vector<2x128xf32>
    %82 = arith.addf %79, %81 : vector<2x128xf32>
    %83 = vector.broadcast %18 : f32 to vector<2x128xf32>
    %84 = arith.mulf %41, %83 : vector<2x128xf32>
    %85 = arith.addf %82, %84 : vector<2x128xf32>
    %86 = arith.negf %85 : vector<2x128xf32>
    %87 = math.exp %86 : vector<2x128xf32>
    %cst_68 = arith.constant 1.000000e+00 : f32
    %88 = vector.broadcast %cst_68 : f32 to vector<2x128xf32>
    %89 = arith.addf %88, %87 : vector<2x128xf32>
    %90 = arith.divf %88, %89 : vector<2x128xf32>
    %cst_69 = arith.constant 8.000000e+00 : f32
    %91 = vector.broadcast %cst_69 : f32 to vector<2x128xf32>
    %92 = arith.mulf %90, %91 : vector<2x128xf32>
    %93 = vector.broadcast %3 : f32 to vector<2x128xf32>
    %94 = arith.mulf %37, %93 : vector<2x128xf32>
    %95 = vector.broadcast %27 : f32 to vector<2x128xf32>
    %96 = arith.addf %94, %95 : vector<2x128xf32>
    %97 = vector.broadcast %11 : f32 to vector<2x128xf32>
    %98 = arith.mulf %39, %97 : vector<2x128xf32>
    %99 = arith.addf %96, %98 : vector<2x128xf32>
    %100 = vector.broadcast %19 : f32 to vector<2x128xf32>
    %101 = arith.mulf %41, %100 : vector<2x128xf32>
    %102 = arith.addf %99, %101 : vector<2x128xf32>
    %103 = arith.negf %102 : vector<2x128xf32>
    %104 = math.exp %103 : vector<2x128xf32>
    %cst_70 = arith.constant 1.000000e+00 : f32
    %105 = vector.broadcast %cst_70 : f32 to vector<2x128xf32>
    %106 = arith.addf %105, %104 : vector<2x128xf32>
    %107 = arith.divf %105, %106 : vector<2x128xf32>
    %cst_71 = arith.constant 8.000000e+00 : f32
    %108 = vector.broadcast %cst_71 : f32 to vector<2x128xf32>
    %109 = arith.mulf %107, %108 : vector<2x128xf32>
    %110 = vector.broadcast %4 : f32 to vector<2x128xf32>
    %111 = arith.mulf %37, %110 : vector<2x128xf32>
    %112 = vector.broadcast %28 : f32 to vector<2x128xf32>
    %113 = arith.addf %111, %112 : vector<2x128xf32>
    %114 = vector.broadcast %12 : f32 to vector<2x128xf32>
    %115 = arith.mulf %39, %114 : vector<2x128xf32>
    %116 = arith.addf %113, %115 : vector<2x128xf32>
    %117 = vector.broadcast %20 : f32 to vector<2x128xf32>
    %118 = arith.mulf %41, %117 : vector<2x128xf32>
    %119 = arith.addf %116, %118 : vector<2x128xf32>
    %120 = arith.negf %119 : vector<2x128xf32>
    %121 = math.exp %120 : vector<2x128xf32>
    %cst_72 = arith.constant 1.000000e+00 : f32
    %122 = vector.broadcast %cst_72 : f32 to vector<2x128xf32>
    %123 = arith.addf %122, %121 : vector<2x128xf32>
    %124 = arith.divf %122, %123 : vector<2x128xf32>
    %cst_73 = arith.constant 0.00999999977 : f32
    %125 = vector.broadcast %cst_73 : f32 to vector<2x128xf32>
    %126 = arith.cmpf ogt, %124, %125 : vector<2x128xf32>
    %127 = arith.extui %126 : vector<2x128xi1> to vector<2x128xi32>
    %128 = arith.sitofp %127 : vector<2x128xi32> to vector<2x128xf32>
    %129 = vector.broadcast %5 : f32 to vector<2x128xf32>
    %130 = arith.mulf %37, %129 : vector<2x128xf32>
    %131 = vector.broadcast %29 : f32 to vector<2x128xf32>
    %132 = arith.addf %130, %131 : vector<2x128xf32>
    %133 = vector.broadcast %13 : f32 to vector<2x128xf32>
    %134 = arith.mulf %39, %133 : vector<2x128xf32>
    %135 = arith.addf %132, %134 : vector<2x128xf32>
    %136 = vector.broadcast %21 : f32 to vector<2x128xf32>
    %137 = arith.mulf %41, %136 : vector<2x128xf32>
    %138 = arith.addf %135, %137 : vector<2x128xf32>
    %cst_74 = arith.constant 0.000000e+00 : f32
    %139 = vector.broadcast %cst_74 : f32 to vector<2x128xf32>
    %140 = vector.broadcast %6 : f32 to vector<2x128xf32>
    %141 = arith.mulf %37, %140 : vector<2x128xf32>
    %142 = vector.broadcast %30 : f32 to vector<2x128xf32>
    %143 = arith.addf %141, %142 : vector<2x128xf32>
    %144 = vector.broadcast %14 : f32 to vector<2x128xf32>
    %145 = arith.mulf %39, %144 : vector<2x128xf32>
    %146 = arith.addf %143, %145 : vector<2x128xf32>
    %147 = vector.broadcast %22 : f32 to vector<2x128xf32>
    %148 = arith.mulf %41, %147 : vector<2x128xf32>
    %149 = arith.addf %146, %148 : vector<2x128xf32>
    %150 = arith.cmpf ogt, %149, %138 : vector<2x128xf32>
    %cst_75 = arith.constant 1.000000e+00 : f32
    %151 = vector.broadcast %cst_75 : f32 to vector<2x128xf32>
    %152 = arith.select %150, %151, %139 : vector<2x128xi1>, vector<2x128xf32>
    %153 = arith.maximumf %138, %149 : vector<2x128xf32>
    %154 = vector.broadcast %7 : f32 to vector<2x128xf32>
    %155 = arith.mulf %37, %154 : vector<2x128xf32>
    %156 = vector.broadcast %31 : f32 to vector<2x128xf32>
    %157 = arith.addf %155, %156 : vector<2x128xf32>
    %158 = vector.broadcast %15 : f32 to vector<2x128xf32>
    %159 = arith.mulf %39, %158 : vector<2x128xf32>
    %160 = arith.addf %157, %159 : vector<2x128xf32>
    %161 = vector.broadcast %23 : f32 to vector<2x128xf32>
    %162 = arith.mulf %41, %161 : vector<2x128xf32>
    %163 = arith.addf %160, %162 : vector<2x128xf32>
    %164 = arith.cmpf ogt, %163, %153 : vector<2x128xf32>
    %cst_76 = arith.constant 2.000000e+00 : f32
    %165 = vector.broadcast %cst_76 : f32 to vector<2x128xf32>
    %166 = arith.select %164, %165, %152 : vector<2x128xi1>, vector<2x128xf32>
    %167 = arith.mulf %58, %128 : vector<2x128xf32>
    %168 = arith.mulf %75, %128 : vector<2x128xf32>
    %169 = arith.mulf %92, %128 : vector<2x128xf32>
    %170 = arith.mulf %109, %128 : vector<2x128xf32>
    %171 = arith.subf %167, %169 : vector<2x128xf32>
    %c0_77 = arith.constant 0 : index
    %c0_78 = arith.constant 0 : index
    %c0_79 = arith.constant 0 : index
    %c0_80 = arith.constant 0 : index
    %172 = vector.load %arg5[%c0_77, %c0_78, %c0_79, %c0_80] : memref<1x6x2x128xf32, #tpu.memory_space<vmem>>, vector<1x1x2x128xf32>
    %173 = vector.shape_cast %172 : vector<1x1x2x128xf32> to vector<2x128xf32>
    %174 = vector.shape_cast %171 : vector<2x128xf32> to vector<1x1x2x128xf32>
    tpu.vector_store %arg5[%c0_77, %c0_78, %c0_79, %c0_80], %174 {strides = array<i32>} : memref<1x6x2x128xf32, #tpu.memory_space<vmem>>, vector<1x1x2x128xf32>,
    %175 = arith.subf %168, %170 : vector<2x128xf32>
    %c0_81 = arith.constant 0 : index
    %c1_82 = arith.constant 1 : index
    %c0_83 = arith.constant 0 : index
    %c0_84 = arith.constant 0 : index
    %176 = vector.load %arg5[%c0_81, %c1_82, %c0_83, %c0_84] : memref<1x6x2x128xf32, #tpu.memory_space<vmem>>, vector<1x1x2x128xf32>
    %177 = vector.shape_cast %176 : vector<1x1x2x128xf32> to vector<2x128xf32>
    %178 = vector.shape_cast %175 : vector<2x128xf32> to vector<1x1x2x128xf32>
    tpu.vector_store %arg5[%c0_81, %c1_82, %c0_83, %c0_84], %178 {strides = array<i32>} : memref<1x6x2x128xf32, #tpu.memory_space<vmem>>, vector<1x1x2x128xf32>,
    %179 = arith.addf %167, %169 : vector<2x128xf32>
    %c0_85 = arith.constant 0 : index
    %c2_86 = arith.constant 2 : index
    %c0_87 = arith.constant 0 : index
    %c0_88 = arith.constant 0 : index
    %180 = vector.load %arg5[%c0_85, %c2_86, %c0_87, %c0_88] : memref<1x6x2x128xf32, #tpu.memory_space<vmem>>, vector<1x1x2x128xf32>
    %181 = vector.shape_cast %180 : vector<1x1x2x128xf32> to vector<2x128xf32>
    %182 = vector.shape_cast %179 : vector<2x128xf32> to vector<1x1x2x128xf32>
    tpu.vector_store %arg5[%c0_85, %c2_86, %c0_87, %c0_88], %182 {strides = array<i32>} : memref<1x6x2x128xf32, #tpu.memory_space<vmem>>, vector<1x1x2x128xf32>,
    %183 = arith.addf %168, %170 : vector<2x128xf32>
    %c0_89 = arith.constant 0 : index
    %c3_90 = arith.constant 3 : index
    %c0_91 = arith.constant 0 : index
    %c0_92 = arith.constant 0 : index
    %184 = vector.load %arg5[%c0_89, %c3_90, %c0_91, %c0_92] : memref<1x6x2x128xf32, #tpu.memory_space<vmem>>, vector<1x1x2x128xf32>
    %185 = vector.shape_cast %184 : vector<1x1x2x128xf32> to vector<2x128xf32>
    %186 = vector.shape_cast %183 : vector<2x128xf32> to vector<1x1x2x128xf32>
    tpu.vector_store %arg5[%c0_89, %c3_90, %c0_91, %c0_92], %186 {strides = array<i32>} : memref<1x6x2x128xf32, #tpu.memory_space<vmem>>, vector<1x1x2x128xf32>,
    %187 = arith.mulf %124, %128 : vector<2x128xf32>
    %c0_93 = arith.constant 0 : index
    %c4_94 = arith.constant 4 : index
    %c0_95 = arith.constant 0 : index
    %c0_96 = arith.constant 0 : index
    %188 = vector.load %arg5[%c0_93, %c4_94, %c0_95, %c0_96] : memref<1x6x2x128xf32, #tpu.memory_space<vmem>>, vector<1x1x2x128xf32>
    %189 = vector.shape_cast %188 : vector<1x1x2x128xf32> to vector<2x128xf32>
    %190 = vector.shape_cast %187 : vector<2x128xf32> to vector<1x1x2x128xf32>
    tpu.vector_store %arg5[%c0_93, %c4_94, %c0_95, %c0_96], %190 {strides = array<i32>} : memref<1x6x2x128xf32, #tpu.memory_space<vmem>>, vector<1x1x2x128xf32>,
    %191 = arith.mulf %166, %128 : vector<2x128xf32>
    %c0_97 = arith.constant 0 : index
    %c5_98 = arith.constant 5 : index
    %c0_99 = arith.constant 0 : index
    %c0_100 = arith.constant 0 : index
    %192 = vector.load %arg5[%c0_97, %c5_98, %c0_99, %c0_100] : memref<1x6x2x128xf32, #tpu.memory_space<vmem>>, vector<1x1x2x128xf32>
    %193 = vector.shape_cast %192 : vector<1x1x2x128xf32> to vector<2x128xf32>
    %194 = vector.shape_cast %191 : vector<2x128xf32> to vector<1x1x2x128xf32>
    tpu.vector_store %arg5[%c0_97, %c5_98, %c0_99, %c0_100], %194 {strides = array<i32>} : memref<1x6x2x128xf32, #tpu.memory_space<vmem>>, vector<1x1x2x128xf32>,
    %c0_101 = arith.constant 0 : index
    %c0_102 = arith.constant 0 : index
    %c0_103 = arith.constant 0 : index
    %c0_104 = arith.constant 0 : index
    %195 = vector.load %arg6[%c0_101, %c0_102, %c0_103, %c0_104] : memref<1x1x1x128xf32, #tpu.memory_space<vmem>>, vector<1x1x1x128xf32>
    %196 = vector.shape_cast %195 : vector<1x1x1x128xf32> to vector<1x128xf32>
    %cst_105 = arith.constant dense<0.000000e+00> : vector<128xf32>
    %197 = vector.multi_reduction <add>, %128, %cst_105 [0] : vector<2x128xf32> to vector<128xf32>
    %198 = vector.shape_cast %197 : vector<128xf32> to vector<1x128xf32>
    %199 = arith.addf %196, %198 : vector<1x128xf32>
    %c0_106 = arith.constant 0 : index
    %c0_107 = arith.constant 0 : index
    %c0_108 = arith.constant 0 : index
    %c0_109 = arith.constant 0 : index
    %200 = vector.load %arg6[%c0_106, %c0_107, %c0_108, %c0_109] : memref<1x1x1x128xf32, #tpu.memory_space<vmem>>, vector<1x1x1x128xf32>
    %201 = vector.shape_cast %200 : vector<1x1x1x128xf32> to vector<1x128xf32>
    %202 = vector.shape_cast %199 : vector<1x128xf32> to vector<1x1x1x128xf32>
    tpu.vector_store %arg6[%c0_106, %c0_107, %c0_108, %c0_109], %202 {strides = array<i32>} : memref<1x1x1x128xf32, #tpu.memory_space<vmem>>, vector<1x1x1x128xf32>,
    return
  }
  func.func @transform_0(%arg0: i32, %arg1: i32) -> (i32, i32) {
    %c0_i32 = arith.constant 0 : i32
    %c0_i32_0 = arith.constant 0 : i32
    %c0_i32_1 = arith.constant 0 : i32
    return %c0_i32, %c0_i32_0 : i32, i32
  }
  func.func @transform_1(%arg0: i32, %arg1: i32) -> i32 {
    %c0_i32 = arith.constant 0 : i32
    %c0_i32_0 = arith.constant 0 : i32
    return %c0_i32 : i32
  }
  func.func @transform_2(%arg0: i32, %arg1: i32) -> (i32, i32, i32, i32) {
    %c0_i32 = arith.constant 0 : i32
    %c0_i32_0 = arith.constant 0 : i32
    %c0_i32_1 = arith.constant 0 : i32
    return %arg0, %c0_i32, %arg1, %c0_i32_0 : i32, i32, i32, i32
  }
  func.func @transform_3(%arg0: i32, %arg1: i32) -> (i32, i32, i32, i32) {
    %c0_i32 = arith.constant 0 : i32
    %c0_i32_0 = arith.constant 0 : i32
    %c0_i32_1 = arith.constant 0 : i32
    return %arg0, %c0_i32, %arg1, %c0_i32_0 : i32, i32, i32, i32
  }
  func.func @transform_4(%arg0: i32, %arg1: i32) -> (i32, i32, i32, i32) {
    %c0_i32 = arith.constant 0 : i32
    %c0_i32_0 = arith.constant 0 : i32
    %c0_i32_1 = arith.constant 0 : i32
    return %arg0, %arg1, %c0_i32, %c0_i32_0 : i32, i32, i32, i32
  }
}

</mosaic_0001>

<bundles_post_ra>
// kernel: tpu_custom_call.1
= control target key start
LH: loop header
LB: loop body
LE: loop exit
PB: predicated region body
PF: predicated region fallthrough
CT: control target
= control target key end

     0   :  { %s1334_s0 = inlined_call_operand.hbm [shape: f32[3,8], index: 0, kind: input, shape index: {}]   ;;  %s1335_s1 = inlined_call_operand.vmem [shape: f32[8], index: 1, kind: input, shape index: {}]   ;;  %s1336_s2 = inlined_call_operand.hbm [shape: f32[2,3,2,128], index: 2, kind: input, shape index: {}]   ;;  %s1337_s3 = inlined_call_operand.hbm [shape: f32[2,6,2,128], index: 3, kind: output, shape index: {0}]   ;;  %s1338_s4 = inlined_call_operand.hbm [shape: f32[2,1,1,128], index: 4, kind: output, shape index: {1}]  }
   0x1   :  { %1340 = sst [smem:[#allocation17_spill]] %s1334_s0 }
   0x2   :  { %1341 = sst [smem:[#allocation18_spill]] %s1335_s1 }
   0x3   :  { %10 = vsyncpa [#allocation5], 0 }
   0x4   :  { %11 = vsyncpa [#allocation6], 0 }
   0x5   :  { %12 = vsyncpa [#allocation3], 0 }
   0x6   :  { %14 = vsyncpa [#allocation3 + $0x1], 0 }
   0x7   :  { %15 = vsyncpa [#allocation4], 0 }
   0x8   :  { %17 = vsyncpa [#allocation4 + $0x1], 0 }
   0x9   :  { %18 = vsyncpa [#allocation11], 0 }
   0xa   :  { %20 = vsyncpa [#allocation11 + $0x1], 0  ;;  %s1017_s15 = smov 0   ;;  %s1019_s16 = smov 0  }
   0xb   :  { %s1021_s17 = smov 0   ;;  %s1023_s18 = smov 0  }
   0xc   :  { %s1025_s19 = smov 0   ;;  %s1027_s20 = smov 0  }
   0xd LB: > { %s633_s21 = sadd.s32 4294967295, %s980_s20   ;;  %s634_s22 = sadd.s32 4294967294, %s980_s20   ;;  %s980_s20 = sphi %s1027_s20, %s26_s20   ;;  %s976_s19 = sphi %s1025_s19, %s1358_s19   ;;  %s972_s18 = sphi %s1023_s18, %s1357_s18   ;;  %s968_s17 = sphi %s1021_s17, %s1356_s17   ;;  %s964_s16 = sphi %s1019_s16, %s1355_s16   ;;  %s960_s15 = sphi %s1017_s15, %s1354_s15  }
   0xe   : > { %s89_s23 = sadd.s32 1, %s968_s17  ;;  %p96_p0 = scmp.ne.s32.totalorder %s968_s17, %s964_s16 }
   0xf   : > { %p97_p1 = scmp.eq.s32.totalorder %s980_s20, 0  ;;  %p102_p2 = scmp.ne.s32.totalorder %s964_s16, %s960_s15 }
  0x10   : > { %p1055_p3 = scmp.eq.s32.totalorder %s633_s21, 0  ;;  %p128_p4 = scmp.eq.s32.totalorder %s633_s21, 1 }
  0x11   : > { %p98_p5 = por %p97_p1, %p96_p0  ;;  %p134_p6 = scmp.eq.s32.totalorder %s634_s22, 1 }
  0x12   : > { %p1061_p7 = por %p1055_p3, %p102_p2  ;;  %p1065_p8 = por %p128_p4, %p96_p0 }
  0x13   : > { %p1069_p9 = por %p134_p6, %p102_p2  ;;  %p635_p10 = scmp.ge.s32.totalorder %s980_s20, 1 }
  0x14   : > { %s1344_s26 = scalar_select %p1065_p8, 1, 0 }
  0x15   : > { %s1345_s27 = scalar_select %p1069_p9, 1, 0 }
  0x16   : > { %p169_p11 = scmp.lt.s32.totalorder %s980_s20, 3  ;;  %p729_p1 = scmp.lt.s32.totalorder %s980_s20, 2 }
  0x17   : > { %s1347_s1 = sld [smem:[#allocation18_spill]]  ;;  %s202_s8 = sand.u32 1, %s968_s17  }
  0x18   : > { %p1076_p13 = pnand %p635_p10, %p169_p11  ;;  %p1086_p4 = pnand %p729_p1, %p98_p5 }
  0x19   : > { %s38_s9 = sadd.s32 1, %s976_s19  ;;  %s982_s10 = smov [#allocation2]  }
  0x1a   : > { %p709_p0 = pneg %p1076_p13  ;;  %s1350_s0 = sld [smem:[#allocation17_spill]] }
  0x1c   : > { %p1092_p2 = pnand %p709_p0, %p1055_p3 }
  0x1d   : > { %s191_s5 = sshll.u32 %s1347_s1, 4  ;;  %s192_s5 = int_to_ptr.vmem [resolvable:$true] %s191_s5 }
  0x1e   : > { %s819_s13 = scalar_lea.vmem %s192_s5, 16  ;;  %p821_p6 = pneg %p1092_p2 }
  0x1f   : > { %p820_p5 = scmp.ne.s32.totalorder %s192_s5, %s819_s13  ;;  %p827_p1 = scmp.lt.s32.totalorder %s192_s5, %s192_s5 }
  0x20   : > { %712 = dma.hbm_to_smem (!%p1092_p2), %s1350_s0, 64, %s982_s10, [#allocation5]  }
  0x21   : > { %p822_p10 = pnand %p821_p6, %p820_p5  ;;  %p828_p0 = scmp.lt.s32.totalorder %s819_s13, %s819_s13 }
  0x23   : > { %p823_p11 = pneg %p822_p10  ;;  %p829_p12 = por %p828_p0, %p827_p1 }
  0x25   : > { %p830_p9 = pnand %p829_p12, %p823_p11 }
  0x27   : > { %833 = shalt.err (!%p830_p9)
}
  0x28   : > { %s983_s14 = smov [#allocation7]   ;;  %p40_p8 = scmp.ge.s32.totalorder %s38_s9, 2 }
  0x29   : > { %715 = dma.vmem_to_smem (!%p1092_p2), %s192_s5, 16, %s983_s14, [#allocation6]  }
  0x2a   : > { %s690_s21 = smul.u32 6, %s202_s8  ;;  %s1360_s9 = smov (%p40_p8, %s38_s9), 0 }
  0x2b   : > { %s691_s22 = smul.u32 96, %s976_s19  ;;  %s84_s29 = ssub.s32 %s976_s19, %s1360_s9 }
  0x2c   : > { %s206_s30 = scalar_lea.vmem [#allocation8], %s690_s21  ;;  %p87_p12 = scmp.eq.s32.totalorder %s84_s29, 0 }
  0x2d   : > { %s214_s10 = sshll.u32 %s206_s30, 4  ;;  %s213_s7 = scalar_lea.hbm %s1336_s2, %s691_s22  ;;  %s215_s10 = int_to_ptr.vmem [resolvable:$true] %s214_s10 }
  0x2e   : > { %s1118_s13 = scalar_select %p87_p12, %s968_s17, %s89_s23  }
  0x2f   : > { %s203_s0 = scalar_lea.sflag [#allocation3], %s202_s8  ;;  %p836_p9 = pneg %p1086_p4 }
  0x30   : > { %s847_s5 = scalar_lea.vmem %s215_s10, 96  ;;  %s984_s14 = smov [#allocation8]  }
  0x31   : > { %p848_p8 = scmp.ne.s32.totalorder %s215_s10, %s847_s5  ;;  %s852_s1 = sshll.u32 %s984_s14, 4  ;;  %s853_s1 = int_to_ptr.vmem [resolvable:$false] %s852_s1 }
  0x32   : > { %s854_s21 = scalar_lea.vmem %s853_s1, 192  ;;  %p855_p6 = scmp.lt.s32.totalorder %s215_s10, %s853_s1 }
  0x33   : > { %p850_p2 = pnand %p848_p8, %p836_p9  ;;  %p856_p10 = scmp.lt.s32.totalorder %s854_s21, %s847_s5 }
  0x35   : > { %p851_p5 = pneg %p850_p2  ;;  %p857_p11 = por %p856_p10, %p855_p6 }
  0x37   : > { %p858_p1 = pnand %p857_p11, %p851_p5 }
  0x39   : > { %861 = shalt.err (!%p858_p1)
}
  0x3a   : > { %s985_s22 = smov 32   ;;  %s986_s23 = smov 2  }
  0x3b   : > { %719 = dma.hbm_to_vmem [thread:$0]  (!%p1086_p4), %s213_s7, 96, %s215_s10, %s203_s0, %s985_s22, %s985_s22, %s986_s23  }
  0x3c   : > { %226 = sbr.rel (%p1076_p13) target bundleno = 176 (0xb0), region = 32 }
  0x41   : > { %939 = dma.done.wait (%p1055_p3), [#allocation5], 64  }
  0x42   : > { %941 = vsyncadd (%p1055_p3), [#allocation5], 4294967232 }
  0x43   : > { %943 = dma.done.wait (%p1055_p3), [#allocation6], 16  }
  0x44   : > { %945 = vsyncadd (%p1055_p3), [#allocation6], 4294967280  ;;  %s1135_s1 = sand.u32 1, %s964_s16  }
  0x45   : > { %s692_s0 = smul.u32 6, %s1135_s1  ;;  %s237_s28 = scalar_lea.sflag [#allocation3], %s1135_s1 }
  0x47   : > { %s240_s6 = scalar_lea.vmem [#allocation8], %s692_s0 }
  0x48   : > { %947 = dma.done.wait (%p1061_p7), %s237_s28, 96  }
  0x49   : > { %949 = vsyncadd (%p1061_p7), %s237_s28, 4294967200 }
  0x4a   : > { %245 = sfence }
  0x4b   : > { %s646_s8 = sld [smem:[#allocation2 + $0x4]]  ;;  %s1144_s24 = scalar_lea.vmem [#allocation10], %s1135_s1  ;;  %v987_v0 = vmov 0.0   ;;  %v1148_v1 = vld [vmem:[%s240_s6] sm:$0x3]  ;;  %vm452_vm2 = vcmask 1041408  }
  0x4c   : > { %s654_s29 = sld [smem:[#allocation2 + $0x84]]  ;;  %302 = vst [vmem:[%s1144_s24] sm:$0x1] %v987_v0  ;;  %v1150_v2 = vld [vmem:[%s240_s6 + $0x2] sm:$0x3]  ;;  %v1152_v4 = vld [vmem:[%s240_s6 + $0x4] sm:$0x3] }
  0x4d   : > { %s662_s30 = sld [smem:[#allocation2 + $0x104]]  ;;  %p1351_p7 = scmp.ne.s32.totalorder %s1344_s26, 0 }
  0x4e   : > { %s669_s10 = sld [smem:[#allocation7 + $0x4]] }
  0x4f   : > { %s270_s11 = sld [smem:[#allocation2]] }
  0x50   : > { %s644_s12 = sld [smem:[#allocation2 + $0x2]] }
  0x51   : > { %v376_v3 = vstv %s646_s8  ;;  %s650_s25 = sld [smem:[#allocation2 + $0x80]] }
  0x52   : > { %v377_v5 = vmul.f32 %v376_v3, %v1148_v1  ;;  %v380_v6 = vstv %s654_s29  ;;  %s652_s7 = sld [smem:[#allocation2 + $0x82]] }
  0x53   : > { %v381_v7 = vmul.f32 %v1150_v2, %v380_v6  ;;  %v383_v8 = vstv %s662_s30  ;;  %s658_s5 = sld [smem:[#allocation2 + $0x100]] }
  0x54   : > { %v378_v9 = vstv %s669_s10  ;;  %s660_s14 = sld [smem:[#allocation2 + $0x102]]  ;;  %v384_v11 = vmul.f32 %v1152_v4, %v383_v8 }
  0x55   : > { %v379_v10 = vadd.f32 %v378_v9, %v377_v5  ;;  %s294_s21 = sld [smem:[#allocation7]]  ;;  %v308_v12 = vstv %s270_s11 }
  0x56   : > { %s667_s22 = sld [smem:[#allocation7 + $0x2]]  ;;  %v342_v13 = vstv %s644_s12  ;;  %v309_v16 = vmul.f32 %v308_v12, %v1148_v1 }
  0x57   : > { %v382_v14 = vadd.f32 %v381_v7, %v379_v10  ;;  %v312_v15 = vstv %s650_s25  ;;  %s1157_s23 = sld [smem:[#allocation2 + $0x1]]  ;;  %v343_v20 = vmul.f32 %v342_v13, %v1148_v1 }
  0x58   : > { %v346_v17 = vstv %s652_s7  ;;  %s1160_s0 = sld [smem:[#allocation2 + $0x3]]  ;;  %v313_v21 = vmul.f32 %v1150_v2, %v312_v15 }
  0x59   : > { %v385_v18 = vadd.f32 %v384_v11, %v382_v14  ;;  %v315_v19 = vstv %s658_s5  ;;  %s1163_s28 = sld [smem:[#allocation2 + $0x81]]  ;;  %v347_v25 = vmul.f32 %v1150_v2, %v346_v17 }
  0x5a   : > { %v349_v22 = vstv %s660_s14  ;;  %s1166_s6 = sld [smem:[#allocation2 + $0x83]]  ;;  %v316_v27 = vmul.f32 %v1152_v4, %v315_v19 }
  0x5b   : > { %v679_v23 = vmul.f32 -1.442695, %v385_v18  ;;  %v310_v24 = vstv %s294_s21  ;;  %s1169_s8 = sld [smem:[#allocation2 + $0x101]]  ;;  %v350_v30 = vmul.f32 %v1152_v4, %v349_v22 }
  0x5c   : > { %v311_v26 = vadd.f32 %v310_v24, %v309_v16  ;;  %v344_v28 = vstv %s667_s22  ;;  %s1172_s29 = sld [smem:[#allocation2 + $0x103]] }
  0x5d   : > { %788 = vpow2.f32 %v679_v23  ;;  %v345_v29 = vadd.f32 %v344_v28, %v343_v20  ;;  %s666_s30 = sld [smem:[#allocation7 + $0x1]]  ;;  %v325_v31 = vstv %s1157_s23 }
  0x5e   : > { %v314_v32 = vadd.f32 %v313_v21, %v311_v26  ;;  %s668_s10 = sld [smem:[#allocation7 + $0x3]]  ;;  %v359_v33 = vstv %s1160_s0  ;;  %v326_v37 = vmul.f32 %v325_v31, %v1148_v1 }
  0x5f   : > { %v348_v34 = vadd.f32 %v347_v25, %v345_v29  ;;  %v329_v35 = vstv %s1163_s28  ;;  %s1178_s11 = sld [smem:[#allocation2 + $0x5]]  ;;  %v360_v41 = vmul.f32 %v359_v33, %v1148_v1 }
  0x60   : > { %v317_v36 = vadd.f32 %v316_v27, %v314_v32  ;;  %v363_v38 = vstv %s1166_s6  ;;  %s1182_s12 = sld [smem:[#allocation2 + $0x6]]  ;;  %v330_v43 = vmul.f32 %v1150_v2, %v329_v35 }
  0x61   : > { %v351_v39 = vadd.f32 %v350_v30, %v348_v34  ;;  %v332_v40 = vstv %s1169_s8  ;;  %s1186_s25 = sld [smem:[#allocation2 + $0x7]]  ;;  %v364_v47 = vmul.f32 %v1150_v2, %v363_v38  ;;  %s693_s8 = smul.u32 12, %s1135_s1 }
  0x62   : > { %v675_v42 = vmul.f32 -1.442695, %v317_v36  ;;  %v366_v44 = vstv %s1172_s29  ;;  %s1190_s7 = sld [smem:[#allocation2 + $0x85]]  ;;  %v333_v49 = vmul.f32 %v1152_v4, %v332_v40 }
  0x63   : > { %v677_v45 = vmul.f32 -1.442695, %v351_v39  ;;  %v327_v46 = vstv %s666_s30  ;;  %s1193_s5 = sld [smem:[#allocation2 + $0x86]]  ;;  %v367_v52 = vmul.f32 %v1152_v4, %v366_v44  ;;  %s1231_s29 = scalar_lea.vmem [#allocation9], %s693_s8 }
  0x64   : > { %790 = vpow2.f32 %v675_v42  ;;  %v328_v48 = vadd.f32 %v327_v46, %v326_v37  ;;  %v361_v50 = vstv %s668_s10  ;;  %s1196_s14 = sld [smem:[#allocation2 + $0x87]]  ;;  %s687_s30 = sshll.u32 %s972_s18, 4 }
  0x65   : > { %792 = vpow2.f32 %v677_v45  ;;  %v362_v51 = vadd.f32 %v361_v50, %v360_v41  ;;  %s1199_s21 = sld [smem:[#allocation2 + $0x105]]  ;;  %v395_v56 = vstv %s1178_s11  ;;  %s498_s10 = sshll.u32 %s1144_s24, 4  ;;  %s1247_s10 = int_to_ptr.vmem [resolvable:$true] %s498_s10 }
  0x66   : > { %v331_v53 = vadd.f32 %v330_v43, %v328_v48  ;;  %s1201_s22 = sld [smem:[#allocation2 + $0x106]]  ;;  %v405_v58 = vstv %s1182_s12  ;;  %v396_v5 = vmul.f32 %v395_v56, %v1148_v1  ;;  %v451_v56 = vld [vmem:[%s1144_s24] sm:$0x1] }
  0x67   : > { %v365_v54 = vadd.f32 %v364_v47, %v362_v51  ;;  %s1203_s23 = sld [smem:[#allocation2 + $0x107]]  ;;  %v418_v62 = vstv %s1186_s25  ;;  %v406_v8 = vmul.f32 %v405_v58, %v1148_v1  ;;  %s1245_s25 = scalar_lea.hbm %s1338_s4, %s687_s30 }
  0x68   : > { %v334_v55 = vadd.f32 %v333_v49, %v331_v53  ;;  %s670_s0 = sld [smem:[#allocation7 + $0x5]]  ;;  %v399_v61 = vstv %s1190_s7  ;;  %v419_v12 = vmul.f32 %v418_v62, %v1148_v1  ;;  %s481_s7 = sshll.u32 %s1231_s29, 4  ;;  %s1277_s7 = int_to_ptr.vmem [resolvable:$true] %s481_s7 }
  0x69   : > { %v368_v57 = vadd.f32 %v367_v52, %v365_v54  ;;  %s671_s28 = sld [smem:[#allocation7 + $0x6]]  ;;  %v409_v6 = vstv %s1193_s5  ;;  %v400_v10 = vmul.f32 %v1150_v2, %v399_v61  ;;  %s694_s5 = smul.u32 192, %s972_s18 }
  0x6a   : > { %v789_v59 = vpop.eup %788  ;;  %v676_v60 = vmul.f32 -1.442695, %v334_v55  ;;  %s672_s6 = sld [smem:[#allocation7 + $0x7]]  ;;  %v422_v9 = vstv %s1196_s14  ;;  %v410_v14 = vmul.f32 %v1150_v2, %v409_v6  ;;  %s468_s14 = scalar_lea.sflag [#allocation11], %s1135_s1 }
  0x6b   : > { %v389_v63 = vadd.f32 1.0, %v789_v59  ;;  %v678_v3 = vmul.f32 -1.442695, %v368_v57  ;;  %v402_v7 = vstv %s1199_s21  ;;  %v423_v19 = vmul.f32 %v1150_v2, %v422_v9  ;;  %s862_s21 = scalar_lea.vmem %s1247_s10, 16 }
  0x6c   : > { %794 = vpow2.f32 %v676_v60  ;;  %v412_v11 = vstv %s1201_s22  ;;  %v403_v17 = vmul.f32 %v1152_v4, %v402_v7  ;;  %p863_p3 = scmp.ne.s32.totalorder %s1247_s10, %s862_s21  ;;  %s988_s22 = smov [#allocation10]  }
  0x6d   : > { %796 = vrcp.f32 %v389_v63  ;;  %v425_v15 = vstv %s1203_s23  ;;  %v413_v21 = vmul.f32 %v1152_v4, %v412_v11  ;;  %s866_s23 = sshll.u32 %s988_s22, 4  ;;  %s867_s23 = int_to_ptr.vmem [resolvable:$false] %s866_s23 }
  0x6e   : > { %798 = vpow2.f32 %v678_v3  ;;  %v397_v13 = vstv %s670_s0  ;;  %v426_v1 = vmul.f32 %v1152_v4, %v425_v15  ;;  %p864_p13 = pnand %p863_p3, %p1351_p7  ;;  %s868_s0 = scalar_lea.vmem %s867_s23, 32 }
  0x6f   : > { %v398_v16 = vadd.f32 %v397_v13, %v396_v5  ;;  %v407_v18 = vstv %s671_s28  ;;  %p869_p0 = scmp.lt.s32.totalorder %s1247_s10, %s867_s23  ;;  %p870_p12 = scmp.lt.s32.totalorder %s868_s0, %s862_s21 }
  0x70   : > { %v408_v20 = vadd.f32 %v407_v18, %v406_v8  ;;  %v420_v22 = vstv %s672_s6  ;;  %p865_p4 = pneg %p864_p13 }
  0x71   : > { %v791_v23 = vpop.eup %790  ;;  %v401_v24 = vadd.f32 %v400_v10, %v398_v16  ;;  %v421_v25 = vadd.f32 %v420_v22, %v419_v12  ;;  %p871_p9 = por %p870_p12, %p869_p0 }
  0x72   : > { %v793_v26 = vpop.eup %792  ;;  %v321_v27 = vadd.f32 1.0, %v791_v23  ;;  %v411_v28 = vadd.f32 %v410_v14, %v408_v20 }
  0x73   : > { %v355_v29 = vadd.f32 1.0, %v793_v26  ;;  %v404_v30 = vadd.f32 %v403_v17, %v401_v24  ;;  %v424_v31 = vadd.f32 %v423_v19, %v421_v25  ;;  %p872_p8 = pnand %p871_p9, %p865_p4 }
  0x74   : > { %800 = vrcp.f32 %v321_v27  ;;  %v414_v32 = vadd.f32 %v413_v21, %v411_v28 }
  0x75   : > { %802 = vrcp.f32 %v355_v29  ;;  %v427_v2 = vadd.f32 %v426_v1, %v424_v31 }
  0x76   : > { %vm415_vm0 = vcmp.gt.f32.partialorder %v414_v32, %v404_v30  ;;  %v417_v33 = vmax.f32 %v404_v30, %v414_v32 }
  0x77   : > { %v416_v34 = vsel %vm415_vm0, 1.0, %v987_v0 }
  0x78   : > { %vm428_vm1 = vcmp.gt.f32.partialorder %v427_v2, %v417_v33 }
  0x79   : > { %v795_v35 = vpop.eup %794  ;;  %v429_v4 = vsel %vm428_vm1, 2.0, %v416_v34 }
  0x7a   : > { %v797_v36 = vpop.eup %796  ;;  %v338_v37 = vadd.f32 1.0, %v795_v35 }
  0x7b   : > { %v799_v38 = vpop.eup %798  ;;  %vm392_vm3 = vcmp.gt.f32.partialorder %v797_v36, 0.01 }
  0x7c   : > { %v1226_v39 = vsel %vm392_vm3, 1.0, %v987_v0  ;;  %804 = vrcp.f32 %v338_v37  ;;  %v372_v40 = vadd.f32 1.0, %v799_v38 }
  0x7d   : > { %v445_v41 = vmul.f32 %v797_v36, %v1226_v39  ;;  %v448_v42 = vmul.f32 %v1226_v39, %v429_v4  ;;  %v453_v43 = vsel %vm452_vm2, %v1226_v39, 0.0 }
  0x7e   : > { %806 = vrcp.f32 %v372_v40  ;;  %v454_v44 = vrot.slane %v453_v43, 4 }
  0x7f   : > { %684 = vst [vmem:[%s1231_s29 + $0x8] sm:$0x3] %v445_v41  ;;  %685 = vst [vmem:[%s1231_s29 + $0xa] sm:$0x3] %v448_v42 }
  0x80   : > { %v455_v0 = vadd.f32 %v454_v44, %v453_v43 }
  0x81   : > { %v801_v45 = vpop.eup %800 }
  0x82   : > { %v803_v46 = vpop.eup %802  ;;  %v324_v47 = vmul.f32 16.0, %v801_v45  ;;  %v456_v48 = vrot.slane %v455_v0, 2 }
  0x83   : > { %v358_v49 = vmul.f32 8.0, %v803_v46 }
  0x84   : > { %v430_v50 = vmul.f32 %v1226_v39, %v324_v47  ;;  %v457_v51 = vadd.f32 %v456_v48, %v455_v0 }
  0x85   : > { %v432_v52 = vmul.f32 %v1226_v39, %v358_v49 }
  0x86   : > { %v458_v53 = vrot.slane %v457_v51, 1 }
  0x87   : > { %v434_v54 = vsub.f32 %v430_v50, %v432_v52  ;;  %v439_v55 = vadd.f32 %v432_v52, %v430_v50 }
  0x88   : > { %v459_v57 = vadd.f32 %v458_v53, %v457_v51 }
  0x89   : > { %v805_v58 = vpop.eup %804  ;;  %435 = vst [vmem:[%s1231_s29] sm:$0x3] %v434_v54  ;;  %682 = vst [vmem:[%s1231_s29 + $0x4] sm:$0x3] %v439_v55 }
  0x8a   : > { %v341_v59 = vmul.f32 16.0, %v805_v58  ;;  %v460_v60 = vadd.f32 %v459_v57, %v451_v56 }
  0x8b   : > { %v807_v61 = vpop.eup %806 }
  0x8c   : > { %v375_v62 = vmul.f32 8.0, %v807_v61  ;;  %v431_v63 = vmul.f32 %v1226_v39, %v341_v59  ;;  %461 = vst [vmem:[%s1144_s24] sm:$0x1] %v460_v60 }
  0x8d   : > { %875 = shalt.err (!%p872_p8)
}
  0x8e   : > { %s876_s24 = scalar_lea.hbm %s1245_s25, 16  ;;  %s880_s8 = scalar_lea.hbm %s1338_s4, 32 }
  0x8f   : > { %p877_p2 = scmp.ne.s32.totalorder %s1245_s25, %s876_s24  ;;  %p881_p10 = scmp.lt.s32.totalorder %s1245_s25, %s1338_s4 }
  0x90   : > { %p882_p11 = scmp.lt.s32.totalorder %s880_s8, %s876_s24 }
  0x91   : > { %p878_p5 = pnand %p877_p2, %p1351_p7 }
  0x92   : > { %p883_p1 = por %p882_p11, %p881_p10 }
  0x93   : > { %p879_p6 = pneg %p878_p5 }
  0x95   : > { %p884_p3 = pnand %p883_p1, %p879_p6 }
  0x97   : > { %887 = shalt.err (!%p884_p3)
}
  0x98   : > { %706 = dma.vmem_to_hbm [thread:$0]  (%p1351_p7), %s1247_s10, 16, %s1245_s25, %s468_s14   ;;  %v433_v3 = vmul.f32 %v1226_v39, %v375_v62 }
  0x99   : > { %s1284_s22 = scalar_lea.hbm %s1337_s3, %s694_s5  ;;  %s463_s23 = scalar_lea.sflag [#allocation4], %s1135_s1 }
  0x9a   : > { %v436_v5 = vsub.f32 %v431_v63, %v433_v3  ;;  %v442_v6 = vadd.f32 %v433_v3, %v431_v63  ;;  %s888_s10 = scalar_lea.vmem %s1277_s7, 192  ;;  %s989_s25 = smov [#allocation9]  }
  0x9b   : > { %p889_p13 = scmp.ne.s32.totalorder %s1277_s7, %s888_s10  ;;  %s892_s14 = sshll.u32 %s989_s25, 4  ;;  %s893_s14 = int_to_ptr.vmem [resolvable:$false] %s892_s14 }
  0x9c   : > { %681 = vst [vmem:[%s1231_s29 + $0x2] sm:$0x3] %v436_v5  ;;  %683 = vst [vmem:[%s1231_s29 + $0x6] sm:$0x3] %v442_v6  ;;  %s894_s0 = scalar_lea.vmem %s893_s14, 384  ;;  %p895_p12 = scmp.lt.s32.totalorder %s1277_s7, %s893_s14 }
  0x9d   : > { %p890_p4 = pnand %p889_p13, %p1351_p7  ;;  %p896_p9 = scmp.lt.s32.totalorder %s894_s0, %s888_s10 }
  0x9f   : > { %p891_p0 = pneg %p890_p4  ;;  %p897_p8 = por %p896_p9, %p895_p12 }
  0xa1   : > { %p898_p2 = pnand %p897_p8, %p891_p0 }
  0xa3   : > { %901 = shalt.err (!%p898_p2)
}
  0xa4   : > { %s902_s18 = scalar_lea.hbm %s1284_s22, 192  ;;  %s906_s24 = scalar_lea.hbm %s1337_s3, 384 }
  0xa5   : > { %p903_p5 = scmp.ne.s32.totalorder %s1284_s22, %s902_s18  ;;  %p907_p11 = scmp.lt.s32.totalorder %s1284_s22, %s1337_s3 }
  0xa6   : > { %p908_p1 = scmp.lt.s32.totalorder %s906_s24, %s902_s18 }
  0xa7   : > { %p904_p6 = pnand %p903_p5, %p1351_p7 }
  0xa8   : > { %p909_p3 = por %p908_p1, %p907_p11 }
  0xa9   : > { %p905_p10 = pneg %p904_p6 }
  0xab   : > { %p910_p13 = pnand %p909_p3, %p905_p10 }
  0xad   : > { %913 = shalt.err (!%p910_p13)
}
  0xae   : > { %s990_s8 = smov 32   ;;  %s991_s30 = smov 2  }
  0xaf   : > { %705 = dma.vmem_to_hbm [thread:$0]  (%p1351_p7), %s1277_s7, 192, %s1284_s22, %s463_s23, %s990_s8, %s990_s8, %s991_s30  }
  0xb0 PF: > { %s510_s11 = sand.u32 1, %s960_s15   ;;  %p1352_p4 = scmp.ne.s32.totalorder %s1345_s27, 0 }
  0xb1   : > { %p1353_p0 = scmp.ge.s32.totalorder %s980_s20, 2  ;;  %s511_s12 = scalar_lea.sflag [#allocation4], %s510_s11 }
  0xb3   : > { %p721_p12 = pnand %p1353_p0, %p1352_p4 }
  0xb5   : > { %p722_p9 = pneg %p721_p12 }
  0xb7   : > { %951 = dma.done.wait (%p722_p9), %s511_s12, 192  }
  0xb8   : > { %953 = vsyncadd (%p722_p9), %s511_s12, 4294967104  ;;  %s520_s21 = scalar_lea.sflag [#allocation11], %s510_s11 }
  0xb9   : > { %955 = dma.done.wait (%p722_p9), %s520_s21, 16  }
  0xba   : > { %957 = vsyncadd (%p722_p9), %s520_s21, 4294967280  ;;  %s26_s20 = sadd.s32 1, %s980_s20   ;;  %s1354_s15 = smov %s964_s16 }
  0xbb   : > { %p23_p8 = scmp.ge.s32.totalorder %s26_s20, 4   ;;  %s1355_s16 = smov %s968_s17 }
  0xbc   : > { %s1356_s17 = smov %s1118_s13  ;;  %s1357_s18 = smov %s976_s19 }
  0xbd   : > { %s1358_s19 = smov %s1360_s9  ;;  %25 = sbr.rel (!%p23_p8) target bundleno = 13 (0xd), region = 111 }
  0xc2   :  { %524 = vsyncpa [#allocation3], 1 }
  0xc3   :  { %526 = vsyncpa [#allocation3 + $0x1], 1 }
  0xc4   :  { %527 = vsyncpa [#allocation4], 1 }
  0xc5   :  { %529 = vsyncpa [#allocation4 + $0x1], 1 }
  0xc6   :  { %530 = vsyncpa [#allocation11], 1 }
  0xc7   :  { %532 = vsyncpa [#allocation11 + $0x1], 1 }
  0xc8   :  { %533 = vsyncpa [#allocation5], 1 }
  0xc9   :  { %535 = vsyncpa [#allocation5 + $0x1], 1 }
  0xca   :  { %536 = vsyncpa [#allocation6], 1 }
  0xcb   :  { %538 = vsyncpa [#allocation6 + $0x1], 1 }

</bundles_post_ra>
